<compile_context>
chip_gen: v7x
topology: tpu7x:2x2x1
jax: 0.10.0
libtpu: 0.0.40
codegen_flags: <defaults>
</compile_context>

<pallas_src>
import math

import jax
import jax.numpy as jnp
from jax import lax
from jax.experimental import pallas as pl
from jax.experimental.pallas import tpu as pltpu


def _round_up(x: int, m: int) -> int:
    return ((x + m - 1) // m) * m


def _choose_tile_m(M: int, block_m: int, sublane: int) -> int:
    """Pick a row-tile size: multiple of `sublane`, or the full (ragged) M."""
    if M <= sublane:
        return M                       # one block equal to the full array dim
    if M <= block_m:
        # Split into ~2 blocks so a 2-TensorCore part can use both cores.
        half = _round_up(pl.cdiv(M, 2), sublane)
        return half if half < M else M
    return _round_up(block_m, sublane)


def _vit_intermediate_kernel(x_ref, w_ref, b_ref, o_ref):
    # x_ref: (TM, H) compute dtype      w_ref: (H, I) compute dtype (pre-transposed)
    # b_ref: (1, I)  float32            o_ref: (TM, I) out dtype
    acc = jnp.dot(x_ref[...], w_ref[...], preferred_element_type=jnp.float32)
    acc = acc + b_ref[...]
    # Exact (erf-based) GELU, matching HF "gelu".
    acc = 0.5 * acc * (1.0 + lax.erf(acc * (1.0 / math.sqrt(2.0))))
    o_ref[...] = acc.astype(o_ref.dtype)


def vit_intermediate(hidden_states, weight, bias, *, block_m=512,
                     compute_dtype=jnp.bfloat16, out_dtype=None):
    """ViTIntermediate forward.

    hidden_states: (B, S, H)
    weight:        (I, H)   -- nn.Linear(hidden_size, intermediate_size).weight
    bias:          (I,)
    compute_dtype: MXU input dtype (default bf16; accumulation is always f32).
    out_dtype:     output dtype (default: dtype of hidden_states).
    """
    B, S, H = hidden_states.shape
    I, H_w = weight.shape
    assert H_w == H, "weight must be (intermediate_size, hidden_size)"

    in_dtype = hidden_states.dtype
    out_dtype = in_dtype if out_dtype is None else out_dtype
    compute_dtype = in_dtype if compute_dtype is None else compute_dtype

    M = B * S
    x2d = hidden_states.reshape(M, H).astype(compute_dtype)
    # One-time (per call) transpose + cast; MXU-friendly (K, N) RHS layout.
    w_t = weight.T.astype(compute_dtype)                 # (H, I)
    b2d = bias.astype(jnp.float32).reshape(1, I)         # bias/GELU stay in f32

    cd = jnp.dtype(compute_dtype).itemsize
    od = jnp.dtype(out_dtype).itemsize
    sublane = 16 if cd < 4 else 8                        # bf16 packs 2 rows/sublane

    tm = _choose_tile_m(M, block_m, sublane)
    grid_m = pl.cdiv(M, tm)

    # VMEM budget (double-buffered x/out tiles, conservatively double-buffered
    # resident weight) with headroom; clamp at 64 MiB (v7x physical per-TC VMEM).
    vmem_need = (2 * tm * H * cd + 2 * H * I * cd + 2 * I * 4 + 2 * tm * I * od)
    vmem_limit = int(min(max(2 * vmem_need, 32 << 20), 64 << 20))

    cost = pl.CostEstimate(
        flops=2 * M * H * I,
        transcendentals=M * I,
        bytes_accessed=(M * H * cd + H * I * cd + I * 4 + M * I * od),
    )

    out2d = pl.pallas_call(
        _vit_intermediate_kernel,
        out_shape=jax.ShapeDtypeStruct((M, I), out_dtype),
        grid_spec=pltpu.PrefetchScalarGridSpec(
            num_scalar_prefetch=0,
            grid=(grid_m,),
            in_specs=[
                pl.BlockSpec((tm, H), lambda i: (i, 0)),   # x tile (double-buffered)
                pl.BlockSpec((H, I), lambda i: (0, 0)),    # weight, resident (const idx)
                pl.BlockSpec((1, I), lambda i: (0, 0)),    # bias, resident
            ],
            out_specs=pl.BlockSpec((tm, I), lambda i: (i, 0)),
        ),
        compiler_params=pltpu.CompilerParams(
            dimension_semantics=("parallel",),             # shard M across TCs on v7x
            vmem_limit_bytes=vmem_limit,
        ),
        cost_estimate=cost,
    )(x2d, w_t, b2d)

    return out2d.reshape(B, S, I)


if __name__ == "__main__":
    # Small synthetic config: batch=2, seq=8, hidden=32, intermediate=4*hidden=128
    B, S, H = 2, 8, 32
    I = 4 * H
    key = jax.random.PRNGKey(0)
    k_x, k_w, k_b, k_x2 = jax.random.split(key, 4)

    hidden_states = jax.random.normal(k_x, (B, S, H), dtype=jnp.float32)
    weight = jax.random.normal(k_w, (I, H), dtype=jnp.float32) * 0.02   # nn.Linear layout
    bias = jax.random.normal(k_b, (I,), dtype=jnp.float32) * 0.02

    # Reference: exact-GELU(x @ W^T + b)
    ref = jax.nn.gelu(hidden_states.reshape(B * S, H) @ weight.T + bias,
                      approximate=False).reshape(B, S, I)

    # fp32 reference compute path (tight tolerance).
    out_fp32 = jax.block_until_ready(
        vit_intermediate(hidden_states, weight, bias, compute_dtype=jnp.float32))
    assert out_fp32.shape == (B, S, I)
    assert jnp.allclose(out_fp32, ref, atol=1e-5, rtol=1e-5), "fp32 path mismatch"

    # Default bf16 MXU path (f32 accumulation), looser tolerance.
    out_bf16 = jax.block_until_ready(vit_intermediate(hidden_states, weight, bias))
    assert out_bf16.dtype == hidden_states.dtype
    assert jnp.allclose(out_bf16, ref, atol=2e-2, rtol=2e-2), "bf16 path mismatch"

    # Ragged M (partial last block -> masked stores) + bf16 output dtype.
    hs2 = jax.random.normal(k_x2, (2, 13, H), dtype=jnp.float32)        # M = 26
    ref2 = jax.nn.gelu(hs2.reshape(-1, H) @ weight.T + bias,
                       approximate=False).reshape(2, 13, I)
    out2 = jax.block_until_ready(
        vit_intermediate(hs2, weight, bias, out_dtype=jnp.bfloat16))
    assert out2.shape == (2, 13, I) and out2.dtype == jnp.bfloat16
    assert jnp.allclose(out2.astype(jnp.float32), ref2, atol=3e-2, rtol=3e-2), \
        "ragged / bf16-out path mismatch"

    print("KERNEL_OK")
</pallas_src>

<mosaic_0001>
module attributes {stable_mosaic.version = 11 : i64} {
  func.func @_vit_intermediate_kernel(%arg0: i32, %arg1: memref<8x32xf32, #tpu.memory_space<vmem>>, %arg2: memref<32x128xf32, #tpu.memory_space<vmem>>, %arg3: memref<1x128xf32, #tpu.memory_space<vmem>>, %arg4: memref<8x128xf32, #tpu.memory_space<vmem>>) attributes {dimension_semantics = [#tpu.dimension_semantics<parallel>], iteration_bounds = array<i64: 2>, scalar_prefetch = 0 : i64, scratch_operands = 0 : i64, tpu.core_type = #tpu.core_type<tc>, window_params = [{transform_indices = @transform_0, window_bounds = array<i64: 8, 32>}, {pipeline_mode = #tpu.pipeline_mode<synchronous>, transform_indices = @transform_1, window_bounds = array<i64: 32, 128>}, {pipeline_mode = #tpu.pipeline_mode<synchronous>, transform_indices = @transform_2, window_bounds = array<i64: 1, 128>}, {transform_indices = @transform_3, window_bounds = array<i64: 8, 128>}]} {
    %c0 = arith.constant 0 : index
    %c0_0 = arith.constant 0 : index
    %0 = vector.load %arg1[%c0, %c0_0] : memref<8x32xf32, #tpu.memory_space<vmem>>, vector<8x32xf32>
    %c0_1 = arith.constant 0 : index
    %c0_2 = arith.constant 0 : index
    %1 = vector.load %arg2[%c0_1, %c0_2] : memref<32x128xf32, #tpu.memory_space<vmem>>, vector<32x128xf32>
    %cst = arith.constant dense<0.000000e+00> : vector<8x128xf32>
    %2 = tpu.matmul %0, %1, %cst {dimension_numbers = #tpu.dot_dimension_numbers<[1], [0], [0], [1], [0, 0, 1, 1], [], []>} : vector<8x32xf32>, vector<32x128xf32>, vector<8x128xf32> -> vector<8x128xf32>
    %c0_3 = arith.constant 0 : index
    %c0_4 = arith.constant 0 : index
    %3 = vector.load %arg3[%c0_3, %c0_4] : memref<1x128xf32, #tpu.memory_space<vmem>>, vector<1x128xf32>
    %4 = vector.broadcast %3 : vector<1x128xf32> to vector<8x128xf32>
    %5 = arith.addf %2, %4 : vector<8x128xf32>
    %cst_5 = arith.constant 5.000000e-01 : f32
    %6 = vector.broadcast %cst_5 : f32 to vector<8x128xf32>
    %7 = arith.mulf %6, %5 : vector<8x128xf32>
    %cst_6 = arith.constant 0.707106769 : f32
    %8 = vector.broadcast %cst_6 : f32 to vector<8x128xf32>
    %9 = arith.mulf %5, %8 : vector<8x128xf32>
    %10 = math.erf %9 : vector<8x128xf32>
    %cst_7 = arith.constant 1.000000e+00 : f32
    %11 = vector.broadcast %cst_7 : f32 to vector<8x128xf32>
    %12 = arith.addf %11, %10 : vector<8x128xf32>
    %13 = arith.mulf %7, %12 : vector<8x128xf32>
    %c0_8 = arith.constant 0 : index
    %c0_9 = arith.constant 0 : index
    %14 = vector.load %arg4[%c0_8, %c0_9] : memref<8x128xf32, #tpu.memory_space<vmem>>, vector<8x128xf32>
    tpu.vector_store %arg4[%c0_8, %c0_9], %13 {strides = array<i32>} : memref<8x128xf32, #tpu.memory_space<vmem>>, vector<8x128xf32>,
    return
  }
  func.func @transform_0(%arg0: i32) -> (i32, i32) {
    %c0_i32 = arith.constant 0 : i32
    %c0_i32_0 = arith.constant 0 : i32
    return %arg0, %c0_i32 : i32, i32
  }
  func.func @transform_1(%arg0: i32) -> (i32, i32) {
    %c0_i32 = arith.constant 0 : i32
    %c0_i32_0 = arith.constant 0 : i32
    %c0_i32_1 = arith.constant 0 : i32
    return %c0_i32, %c0_i32_0 : i32, i32
  }
  func.func @transform_2(%arg0: i32) -> (i32, i32) {
    %c0_i32 = arith.constant 0 : i32
    %c0_i32_0 = arith.constant 0 : i32
    %c0_i32_1 = arith.constant 0 : i32
    return %c0_i32, %c0_i32_0 : i32, i32
  }
  func.func @transform_3(%arg0: i32) -> (i32, i32) {
    %c0_i32 = arith.constant 0 : i32
    %c0_i32_0 = arith.constant 0 : i32
    return %arg0, %c0_i32 : i32, i32
  }
}

</mosaic_0001>

<bundles_post_ra>
// kernel: tpu_custom_call.1
= control target key start
LH: loop header
LB: loop body
LE: loop exit
PB: predicated region body
PF: predicated region fallthrough
CT: control target
= control target key end

     0   :  { %8 = vsyncpa [#allocation3], 0  ;;  %s850_s0 = inlined_call_operand.hbm [shape: f32[16,32], index: 0, kind: input, shape index: {}]   ;;  %s851_s1 = inlined_call_operand.hbm [shape: f32[32,128], index: 1, kind: input, shape index: {}]   ;;  %s852_s2 = inlined_call_operand.vmem [shape: f32[1,128], index: 2, kind: input, shape index: {}]   ;;  %s853_s3 = inlined_call_operand.hbm [shape: f32[16,128], index: 3, kind: output, shape index: {}]  }
   0x1   :  { %10 = vsyncpa [#allocation3 + $0x1], 0 }
   0x2   :  { %11 = vsyncpa [#allocation6], 0 }
   0x3   :  { %12 = vsyncpa [#allocation4], 0 }
   0x4   :  { %14 = vsyncpa [#allocation4 + $0x1], 0  ;;  %s647_s12 = smov 0   ;;  %s649_s13 = smov 0  }
   0x5   :  { %s651_s14 = smov 0   ;;  %s653_s15 = smov 0  }
   0x6 LB: > { %s668_s16 = sadd.s32 4294967295, %s617_s15   ;;  %s387_s17 = sadd.s32 4294967294, %s617_s15   ;;  %s617_s15 = sphi %s653_s15, %s873_s15   ;;  %s613_s14 = sphi %s651_s14, %s872_s14   ;;  %s609_s13 = sphi %s649_s13, %s871_s13   ;;  %s605_s12 = sphi %s647_s12, %s870_s12  }
   0x7   : > { %p40_p0 = scmp.ne.s32.totalorder %s609_s13, %s605_s12  ;;  %p854_p1 = scmp.eq.s32.totalorder %s668_s16, 0 }
   0x8   : > { %p112_p3 = scmp.eq.s32.totalorder %s387_s17, 1  ;;  %p388_p5 = scmp.ge.s32.totalorder %s617_s15, 1 }
   0x9   : > { %p677_p4 = por %p854_p1, %p40_p0  ;;  %p119_p7 = scmp.lt.s32.totalorder %s617_s15, 3 }
   0xa   : > { %p682_p6 = por %p112_p3, %p40_p0  ;;  %s619_s21 = smov [#allocation5]  }
   0xb   : > { %s857_s18 = scalar_select %p677_p4, 1, 0 }
   0xc   : > { %s858_s19 = scalar_select %p682_p6, 1, 0 }
   0xd   : > { %p687_p8 = pnand %p388_p5, %p119_p7  ;;  %s131_s22 = sshll.u32 %s619_s21, 4  ;;  %s691_s22 = int_to_ptr.vmem [resolvable:$true] %s131_s22 }
   0xe   : > { %s703_s24 = sadd.s32 1, %s617_s15   ;;  %s27_s25 = sadd.s32 1, %s613_s14 }
   0xf   : > { %s859_s20 = scalar_select %p687_p8, 1, 0 }
  0x10   : > { %p433_p9 = pneg %p687_p8  ;;  %s24_s26 = ssub.s32 %s617_s15, %s703_s24 }
  0x11   : > { %s489_s29 = scalar_lea.hbm %s851_s1, 512 }
  0x12   : > { %p698_p11 = pnand %p433_p9, %p854_p1  ;;  %p490_p12 = scmp.ne.s32.totalorder %s851_s1, %s489_s29 }
  0x13   : > { %p496_p5 = scmp.lt.u32.totalorder %s489_s29, %s851_s1 }
  0x14   : > { %p491_p13 = pneg %p698_p11 }
  0x16   : > { %p492_p0 = pnand %p491_p13, %p490_p12 }
  0x18   : > { %p493_p3 = pneg %p492_p0 }
  0x1a   : > { %p498_p7 = pnand %p496_p5, %p493_p3 }
  0x1c   : > { %501 = shalt.err (!%p498_p7)
}
  0x1d   : > { %s502_s7 = scalar_lea.vmem %s691_s22, 512  ;;  %p510_p2 = scmp.lt.s32.totalorder %s691_s22, %s691_s22 }
  0x1e   : > { %p503_p9 = scmp.ne.s32.totalorder %s691_s22, %s502_s7  ;;  %p511_p6 = scmp.lt.s32.totalorder %s502_s7, %s502_s7 }
  0x20   : > { %p505_p10 = pnand %p503_p9, %p491_p13  ;;  %p512_p4 = por %p511_p6, %p510_p2 }
  0x22   : > { %p506_p1 = pneg %p505_p10 }
  0x24   : > { %p513_p8 = pnand %p512_p4, %p506_p1 }
  0x26   : > { %516 = shalt.err (!%p513_p8)
}
  0x27   : > { %s620_s8 = smov 128   ;;  %s621_s9 = smov 8  }
  0x28   : > { %436 = dma.hbm_to_vmem [thread:$0]  (!%p698_p11), %s851_s1, 512, %s691_s22, [#allocation6], %s620_s8, %s620_s8, %s621_s9  }
  0x29   : > { %p25_p2 = scmp.eq.s32.totalorder %s24_s26, 0  ;;  %p34_p1 = scmp.ne.s32.totalorder %s613_s14, %s609_s13 }
  0x2a   : > { %p35_p4 = scmp.eq.s32.totalorder %s617_s15, 0  ;;  %p446_p6 = scmp.lt.s32.totalorder %s617_s15, 2 }
  0x2b   : > { %s734_s17 = scalar_select %p25_p2, %s613_s14, %s27_s25  }
  0x2c   : > { %p36_p8 = por %p35_p4, %p34_p1  ;;  %p861_p10 = scmp.eq.s32.totalorder %s668_s16, 1 }
  0x2d   : > { %s148_s27 = sand.u32 1, %s613_s14   ;;  %s392_s28 = sshll.u32 %s617_s15, 7 }
  0x2e   : > { %p738_p12 = por %p861_p10, %p34_p1  ;;  %s391_s29 = sshll.u32 %s148_s27, 3 }
  0x2f   : > { %s747_s4 = scalar_lea.hbm %s850_s0, %s392_s28  ;;  %s152_s22 = scalar_lea.vmem [#allocation2], %s391_s29 }
  0x30   : > { %s159_s25 = sshll.u32 %s152_s22, 4  ;;  %p749_p11 = pnand %p446_p6, %p36_p8  ;;  %s753_s25 = int_to_ptr.vmem [resolvable:$true] %s159_s25 }
  0x31   : > { %s149_s5 = scalar_lea.sflag [#allocation3], %s148_s27  ;;  %s517_s6 = scalar_lea.hbm %s747_s4, 128 }
  0x32   : > { %p518_p13 = scmp.ne.s32.totalorder %s747_s4, %s517_s6  ;;  %p519_p0 = pneg %p749_p11 }
  0x33   : > { %s522_s9 = scalar_lea.hbm %s850_s0, 256  ;;  %p523_p7 = scmp.lt.u32.totalorder %s747_s4, %s850_s0 }
  0x34   : > { %p520_p3 = pnand %p519_p0, %p518_p13  ;;  %p524_p9 = scmp.lt.u32.totalorder %s522_s9, %s517_s6 }
  0x35   : > { %p526_p1 = scmp.lt.u32.totalorder %s517_s6, %s747_s4 }
  0x36   : > { %p521_p5 = pneg %p520_p3  ;;  %p525_p2 = por %p524_p9, %p523_p7 }
  0x38   : > { %p527_p4 = por %p526_p1, %p525_p2 }
  0x3a   : > { %p528_p6 = pnand %p527_p4, %p521_p5 }
  0x3c   : > { %531 = shalt.err (!%p528_p6)
}
  0x3d   : > { %s532_s27 = scalar_lea.vmem %s753_s25, 128  ;;  %s622_s28 = smov [#allocation2]  }
  0x3e   : > { %p533_p8 = scmp.ne.s32.totalorder %s753_s25, %s532_s27  ;;  %s537_s29 = sshll.u32 %s622_s28, 4  ;;  %s538_s29 = int_to_ptr.vmem [resolvable:$false] %s537_s29 }
  0x3f   : > { %s539_s23 = scalar_lea.vmem %s538_s29, 256  ;;  %p540_p3 = scmp.lt.s32.totalorder %s753_s25, %s538_s29 }
  0x40   : > { %p535_p10 = pnand %p533_p8, %p519_p0  ;;  %p541_p7 = scmp.lt.s32.totalorder %s539_s23, %s532_s27 }
  0x42   : > { %p536_p13 = pneg %p535_p10  ;;  %p542_p9 = por %p541_p7, %p540_p3 }
  0x44   : > { %p543_p2 = pnand %p542_p9, %p536_p13 }
  0x46   : > { %546 = shalt.err (!%p543_p2)
}
  0x47   : > { %440 = dma.hbm_to_vmem [thread:$0]  (!%p749_p11), %s747_s4, 128, %s753_s25, %s149_s5  }
  0x48   : > { %p864_p5 = scmp.ne.s32.totalorder %s859_s20, 0 }
  0x49   : > { %s783_s30 = sand.u32 (!%p864_p5), 1, %s609_s13   ;;  %p865_p0 = scmp.ne.s32.totalorder (!%p864_p5), %s857_s18, 0 }
  0x4a   : > { %168 = sbr.rel (%p864_p5) target bundleno = 340 (0x154), region = 32  ;;  %s394_s22 = sshll.u32 (!%p864_p5), %s783_s30, 3 }
  0x4b   : > { %s171_s6 = scalar_lea.sflag (!%p864_p5), [#allocation3], %s783_s30  ;;  %s174_s7 = scalar_lea.vmem (!%p864_p5), [#allocation2], %s394_s22 }
  0x51   : > { %592 = dma.done.wait (%p865_p0), %s171_s6, 128  }
  0x52   : > { %594 = vsyncadd (%p865_p0), %s171_s6, 4294967168  ;;  %p866_p11 = scmp.eq.s32.totalorder %s668_s16, 0 }
  0x54   : > { %596 = dma.done.wait (%p866_p11), [#allocation6], 512   ;;  %p867_p1 = pmov %p866_p11 }
  0x55   : > { %v623_v0 = vmov 0.0|0.0   ;;  %vm624_vm0 = vmmov 0   ;;  %v625_v1 = vmov 0.0   ;;  %v202_v2 = vld [vmem:[#allocation5] sm:$0xff]  ;;  %v203_v3 = vld [vmem:[#allocation5 + $0x8] sm:$0xff]  ;;  %v204_v4 = vld [vmem:[#allocation5 + $0x10] sm:$0xff] }
  0x56   : > { %598 = vsyncadd (%p867_p1), [#allocation6], 4294966784  ;;  %419 = vmatprep.subr.bf16.mxu0 %v623_v0  ;;  %416 = vmatprep.mubr.msk.f32.mxu0 %vm624_vm0, %v625_v1  ;;  %v420_v5 = vpack.c.bf16 %v203_v3, %v202_v2  ;;  %v205_v6 = vld [vmem:[#allocation5 + $0x18] sm:$0xff]  ;;  %vm213_vm1 = vcmask 261120   ;;  %v397_v9 = vld [vmem:[%s852_s2] ss:$0 sm:$0xff] }
  0x57   : > { %v423_v7 = vpack.c.bf16 %v205_v6, %v204_v4  ;;  %v201_v8 = vld [vmem:[%s174_s7] sm:$0xff]  ;;  %s400_s4 = sshll.u32 %s668_s16, 7  ;;  %s200_s25 = scalar_lea.vmem [#allocation7], %s394_s22 }
  0x58   : > { %421 = vmatpush3.bf16.msra.mxu0 %v420_v5  ;;  %s307_s26 = sshll.u32 %s200_s25, 4  ;;  %s806_s9 = scalar_lea.hbm %s853_s3, %s400_s4  ;;  %s808_s26 = int_to_ptr.vmem [resolvable:$true] %s307_s26 }
  0x59   : > { %422 = vmatprep.subr.bf16.mxu0 %v623_v0  ;;  %s294_s10 = scalar_lea.sflag [#allocation4], %s783_s30  ;;  %s547_s11 = scalar_lea.vmem %s808_s26, 128 }
  0x5a   : > { %p548_p4 = scmp.ne.s32.totalorder %s808_s26, %s547_s11  ;;  %s626_s16 = smov [#allocation7]  }
  0x5b   : > { %s551_s27 = sshll.u32 %s626_s16, 4  ;;  %s552_s27 = int_to_ptr.vmem [resolvable:$false] %s551_s27 }
  0x5c   : > { %424 = vmatpush3.bf16.msra.mxu0 %v423_v7  ;;  %p549_p6 = pnand %p548_p4, %p738_p12  ;;  %s553_s28 = scalar_lea.vmem %s552_s27, 256 }
  0x5d   : > { %p554_p10 = scmp.lt.s32.totalorder %s808_s26, %s552_s27  ;;  %p555_p13 = scmp.lt.s32.totalorder %s553_s28, %s547_s11 }
  0x5e   : > { %p550_p8 = pneg %p549_p6 }
  0x5f   : > { %417 = vmatmul.mubr.msk.f32.vlgmr.msra.gmra.mrb[0].mxu0 %vm213_vm1, %v201_v8  ;;  %p556_p3 = por %p555_p13, %p554_p10 }
  0x61   : > { %p557_p7 = pnand %p556_p3, %p550_p8 }
 0x132   : > { %v283_v10 = vpop.f32.mrb[0].mxu0 }
 0x133   : > { %v284_v11 = vadd.f32 %v397_v9, %v283_v10  ;;  %v418_v12 = vpop.f32.mrb[1].mxu0 }
 0x135   : > { %v288_v13 = vmul.f32 0.70710677, %v284_v11  ;;  %v287_v15 = vmul.f32 0.5, %v284_v11 }
 0x137   : > { %487 = verf.f32 %v288_v13 }
 0x141   : > { %v488_v14 = vpop.eup %487 }
 0x142   : > { %v290_v16 = vadd.f32 1.0, %v488_v14 }
 0x144   : > { %v291_v17 = vmul.f32 %v290_v16, %v287_v15 }
 0x146   : > { %292 = vst [vmem:[%s200_s25] sm:$0xff] %v291_v17 }
 0x147   : > { %560 = shalt.err (!%p557_p7)
}
 0x148   : > { %s561_s29 = scalar_lea.hbm %s806_s9, 128  ;;  %s565_s22 = scalar_lea.hbm %s853_s3, 256 }
 0x149   : > { %p562_p9 = scmp.ne.s32.totalorder %s806_s9, %s561_s29  ;;  %p566_p0 = scmp.lt.u32.totalorder %s806_s9, %s853_s3 }
 0x14a   : > { %p567_p11 = scmp.lt.u32.totalorder %s565_s22, %s561_s29  ;;  %p569_p4 = scmp.lt.u32.totalorder %s561_s29, %s806_s9 }
 0x14b   : > { %p563_p2 = pnand %p562_p9, %p738_p12 }
 0x14c   : > { %p568_p1 = por %p567_p11, %p566_p0 }
 0x14d   : > { %p564_p5 = pneg %p563_p2 }
 0x14e   : > { %p570_p6 = por %p569_p4, %p568_p1 }
 0x150   : > { %p571_p8 = pnand %p570_p6, %p564_p5 }
 0x152   : > { %574 = shalt.err (!%p571_p8)
}
 0x153   : > { %431 = dma.vmem_to_hbm [thread:$0]  (%p738_p12), %s808_s26, 128, %s806_s9, %s294_s10  }
 0x154 PF: > { %s319_s18 = sand.u32 1, %s605_s12   ;;  %p868_p10 = scmp.ne.s32.totalorder %s858_s19, 0 }
 0x155   : > { %p869_p13 = scmp.ge.s32.totalorder %s617_s15, 2  ;;  %s320_s20 = scalar_lea.sflag [#allocation4], %s319_s18 }
 0x157   : > { %p442_p3 = pnand %p869_p13, %p868_p10 }
 0x159   : > { %600 = dma.done.wait (!%p442_p3), %s320_s20, 128  }
 0x15a   : > { %602 = vsyncadd (!%p442_p3), %s320_s20, 4294967168  ;;  %p17_p7 = scmp.ge.s32.totalorder %s703_s24, 4   ;;  %s870_s12 = smov %s609_s13 }
 0x15b   : > { %s871_s13 = smov %s613_s14  ;;  %s872_s14 = smov %s734_s17 }
 0x15c   : > { %s873_s15 = smov %s703_s24  ;;  %19 = sbr.rel (!%p17_p7) target bundleno = 6 (0x6), region = 81 }
 0x163   :  { %325 = vsyncpa [#allocation3], 1 }
 0x164   :  { %327 = vsyncpa [#allocation3 + $0x1], 1 }
 0x165   :  { %328 = vsyncpa [#allocation6], 1 }
 0x166   :  { %329 = vsyncpa [#allocation4], 1 }
 0x167   :  { %331 = vsyncpa [#allocation4 + $0x1], 1 }

</bundles_post_ra>
